<compile_context>
chip_gen: v7x
topology: tpu7x:2x2x1
jax: 0.10.0
libtpu: 0.0.40
codegen_flags: <defaults>
</compile_context>

<pallas_src>
import functools

import jax
import jax.numpy as jnp
from jax.experimental import pallas as pl
from jax.experimental.pallas import tpu as pltpu

HIDDEN = 2048
OUT = 128
BN_EPS = 1e-5
NORM_EPS = 1e-12
SUBLANE = 8
# Scoped VMEM budget: above the 16/32 MiB defaults, below v7x's 64 MiB physical.
VMEM_LIMIT_BYTES = 48 * 1024 * 1024


def _round_up(x, m):
    return (x + m - 1) // m * m


# ----------------------------------------------------------------------------
# Pass 1: accumulate per-feature sum(h) and sum(h*h) over the whole batch.
# ----------------------------------------------------------------------------
def _stats_kernel(x_ref, w1_ref, hsum_ref, hsq_ref):
    @pl.when(pl.program_id(0) == 0)
    def _():
        hsum_ref[...] = jnp.zeros_like(hsum_ref)
        hsq_ref[...] = jnp.zeros_like(hsq_ref)

    # bf16 operands, f32 accumulation on the MXU.
    h = jnp.dot(x_ref[...], w1_ref[...], preferred_element_type=jnp.float32)
    hsum_ref[...] += jnp.sum(h, axis=0, keepdims=True)
    hsq_ref[...] += jnp.sum(h * h, axis=0, keepdims=True)


# ----------------------------------------------------------------------------
# Pass 2: recompute h, apply folded BN + ReLU, second matmul, L2-normalize.
# ----------------------------------------------------------------------------
def _apply_kernel(x_ref, w1_ref, gamma_ref, beta_ref, w2_ref,
                  hsum_ref, hsq_ref, o_ref, *, inv_n):
    h = jnp.dot(x_ref[...], w1_ref[...], preferred_element_type=jnp.float32)

    # Folded BatchNorm: one mul + one add per element.
    mean = hsum_ref[...] * inv_n
    var = jnp.maximum(hsq_ref[...] * inv_n - mean * mean, 0.0)  # biased var
    scale = gamma_ref[...] * jax.lax.rsqrt(var + BN_EPS)
    shift = beta_ref[...] - mean * scale
    h = jnp.maximum(h * scale + shift, 0.0)                      # BN + ReLU

    # Second linear (2048 -> 128, no bias), bf16 operands / f32 accumulation.
    z = jnp.dot(h.astype(w2_ref.dtype), w2_ref[...],
                preferred_element_type=jnp.float32)

    # F.normalize(dim=1): z / max(||z||, eps)  ==  z * rsqrt(max(||z||^2, eps^2))
    sq = jnp.sum(z * z, axis=1, keepdims=True)
    o_ref[...] = (z * jax.lax.rsqrt(jnp.maximum(sq, NORM_EPS * NORM_EPS))
                  ).astype(o_ref.dtype)


# ----------------------------------------------------------------------------
# Wrapper
# ----------------------------------------------------------------------------
def simclr_projector(x, w1, b1, gamma, beta, w2, *, tile_n=256,
                     matmul_dtype=jnp.bfloat16):
    # b1 has exactly zero effect on the output: BN centering removes it.
    del b1

    n, k = x.shape
    assert w1.shape == (k, HIDDEN) and w2.shape == (HIDDEN, OUT)

    # Row tile: multiple of 8 (sublane), default 256 (safe on v7x's 64 MiB
    # VMEM); bump to 1024-2048 on v5e/v6e for better roofline if desired.
    tile = min(_round_up(tile_n, SUBLANE), _round_up(n, SUBLANE))
    n_pad = _round_up(n, tile)
    if n_pad != n:
        # Zero rows contribute exactly 0 to sum(h)/sum(h*h); we divide by the
        # true n, so the batch statistics stay exact.
        x = jnp.pad(x, ((0, n_pad - n), (0, 0)))
    nt = n_pad // tile

    xm = x.astype(matmul_dtype)
    w1m = w1.astype(matmul_dtype)
    w2m = w2.astype(matmul_dtype)
    gamma = gamma.reshape(1, HIDDEN).astype(jnp.float32)
    beta = beta.reshape(1, HIDDEN).astype(jnp.float32)

    itemsize = jnp.dtype(matmul_dtype).itemsize
    x_bytes = n_pad * k * itemsize
    w1_bytes = k * HIDDEN * itemsize
    w2_bytes = HIDDEN * OUT * itemsize

    resident = lambda shape: pl.BlockSpec(shape, lambda i: (0, 0))

    # ---- pass 1: batch statistics ------------------------------------------
    h_sum, h_sq = pl.pallas_call(
        _stats_kernel,
        out_shape=(jax.ShapeDtypeStruct((1, HIDDEN), jnp.float32),
                   jax.ShapeDtypeStruct((1, HIDDEN), jnp.float32)),
        grid_spec=pltpu.PrefetchScalarGridSpec(
            num_scalar_prefetch=0,
            grid=(nt,),
            in_specs=[pl.BlockSpec((tile, k), lambda i: (i, 0)),
                      resident((k, HIDDEN))],
            out_specs=(resident((1, HIDDEN)), resident((1, HIDDEN)))),
        compiler_params=pltpu.CompilerParams(
            dimension_semantics=("arbitrary",),
            vmem_limit_bytes=VMEM_LIMIT_BYTES),
        cost_estimate=pl.CostEstimate(
            flops=2 * n_pad * k * HIDDEN + 3 * n_pad * HIDDEN,
            transcendentals=0,
            bytes_accessed=x_bytes + w1_bytes + 2 * HIDDEN * 4),
    )(xm, w1m)

    # ---- pass 2: apply BN/ReLU, second matmul, normalize --------------------
    out = pl.pallas_call(
        functools.partial(_apply_kernel, inv_n=1.0 / n),
        out_shape=jax.ShapeDtypeStruct((n_pad, OUT), jnp.float32),
        grid_spec=pltpu.PrefetchScalarGridSpec(
            num_scalar_prefetch=0,
            grid=(nt,),
            in_specs=[pl.BlockSpec((tile, k), lambda i: (i, 0)),
                      resident((k, HIDDEN)),
                      resident((1, HIDDEN)),
                      resident((1, HIDDEN)),
                      resident((HIDDEN, OUT)),
                      resident((1, HIDDEN)),
                      resident((1, HIDDEN))],
            out_specs=pl.BlockSpec((tile, OUT), lambda i: (i, 0))),
        compiler_params=pltpu.CompilerParams(
            dimension_semantics=("parallel",),
            vmem_limit_bytes=VMEM_LIMIT_BYTES),
        cost_estimate=pl.CostEstimate(
            flops=2 * n_pad * k * HIDDEN + 2 * n_pad * HIDDEN * OUT
                  + 4 * n_pad * HIDDEN,
            transcendentals=HIDDEN + n_pad,
            bytes_accessed=x_bytes + w1_bytes + w2_bytes
                           + 4 * HIDDEN * 4 + n_pad * OUT * 4),
    )(xm, w1m, gamma, beta, w2m, h_sum, h_sq)

    return out[:n]


# ----------------------------------------------------------------------------
# Params init / reference
# ----------------------------------------------------------------------------
def init_params(key, input_dim):
    """Deterministic init mirroring nn.Linear / nn.BatchNorm1d shapes."""
    k1, k2, k3 = jax.random.split(key, 3)
    lim1 = 1.0 / jnp.sqrt(input_dim)
    w1 = jax.random.uniform(k1, (input_dim, HIDDEN), jnp.float32, -lim1, lim1)
    b1 = jax.random.uniform(k2, (1, HIDDEN), jnp.float32, -lim1, lim1)
    gamma = jnp.ones((1, HIDDEN), jnp.float32)   # BN weight init
    beta = jnp.zeros((1, HIDDEN), jnp.float32)   # BN bias init
    lim2 = 1.0 / jnp.sqrt(HIDDEN)
    w2 = jax.random.uniform(k3, (HIDDEN, OUT), jnp.float32, -lim2, lim2)
    return w1, b1, gamma, beta, w2


def reference(x, w1, b1, gamma, beta, w2):
    """Pure-f32 PyTorch-semantics reference (includes b1, centered variance)."""
    h = x @ w1 + b1
    mean = h.mean(axis=0, keepdims=True)
    var = ((h - mean) ** 2).mean(axis=0, keepdims=True)
    h = (h - mean) * jax.lax.rsqrt(var + BN_EPS) * gamma + beta
    h = jnp.maximum(h, 0.0)
    z = h @ w2
    norm = jnp.sqrt(jnp.sum(z * z, axis=1, keepdims=True))
    return z / jnp.maximum(norm, NORM_EPS)


if __name__ == "__main__":
    input_dim = 32
    batch = 8

    key = jax.random.PRNGKey(0)
    kx, kp = jax.random.split(key)
    x = jax.random.normal(kx, (batch, input_dim), jnp.float32)
    w1, b1, gamma, beta, w2 = init_params(kp, input_dim)

    out = simclr_projector(x, w1, b1, gamma, beta, w2)
    out = jax.block_until_ready(out)

    ref = reference(x, w1, b1, gamma, beta, w2)
    assert out.shape == (batch, OUT)
    assert bool(jnp.all(jnp.isfinite(out)))
    # Tolerance covers bf16 MXU operands (f32 accumulation) vs the f32 reference.
    assert jnp.allclose(out, ref, atol=2e-2, rtol=2e-2), \
        float(jnp.max(jnp.abs(out - ref)))

    print("KERNEL_OK")
</pallas_src>

<mosaic_0001>
module attributes {stable_mosaic.version = 11 : i64} {
  func.func @_stats_kernel(%arg0: i32, %arg1: memref<8x32xbf16, #tpu.memory_space<vmem>>, %arg2: memref<32x2048xbf16, #tpu.memory_space<vmem>>, %arg3: memref<1x2048xf32, #tpu.memory_space<vmem>>, %arg4: memref<1x2048xf32, #tpu.memory_space<vmem>>) attributes {dimension_semantics = [#tpu.dimension_semantics<arbitrary>], iteration_bounds = array<i64: 1>, scalar_prefetch = 0 : i64, scratch_operands = 0 : i64, tpu.core_type = #tpu.core_type<tc>, window_params = [{transform_indices = @transform_0, window_bounds = array<i64: 8, 32>}, {pipeline_mode = #tpu.pipeline_mode<synchronous>, transform_indices = @transform_1, window_bounds = array<i64: 32, 2048>}, {pipeline_mode = #tpu.pipeline_mode<synchronous>, transform_indices = @transform_2, window_bounds = array<i64: 1, 2048>}, {pipeline_mode = #tpu.pipeline_mode<synchronous>, transform_indices = @transform_3, window_bounds = array<i64: 1, 2048>}]} {
    %c0_i32 = arith.constant 0 : i32
    %0 = arith.cmpi eq, %arg0, %c0_i32 : i32
    %1 = arith.extui %0 : i1 to i32
    %c0_i32_0 = arith.constant 0 : i32
    %2 = arith.cmpi ne, %1, %c0_i32_0 : i32
    scf.if %2 {
      %cst_14 = arith.constant 0.000000e+00 : f32
      %17 = vector.broadcast %cst_14 : f32 to vector<1x2048xf32>
      %c0_15 = arith.constant 0 : index
      %c0_16 = arith.constant 0 : index
      %18 = vector.load %arg3[%c0_15, %c0_16] : memref<1x2048xf32, #tpu.memory_space<vmem>>, vector<1x2048xf32>
      tpu.vector_store %arg3[%c0_15, %c0_16], %17 {strides = array<i32>} : memref<1x2048xf32, #tpu.memory_space<vmem>>, vector<1x2048xf32>,
      %cst_17 = arith.constant 0.000000e+00 : f32
      %19 = vector.broadcast %cst_17 : f32 to vector<1x2048xf32>
      %c0_18 = arith.constant 0 : index
      %c0_19 = arith.constant 0 : index
      %20 = vector.load %arg4[%c0_18, %c0_19] : memref<1x2048xf32, #tpu.memory_space<vmem>>, vector<1x2048xf32>
      tpu.vector_store %arg4[%c0_18, %c0_19], %19 {strides = array<i32>} : memref<1x2048xf32, #tpu.memory_space<vmem>>, vector<1x2048xf32>,
    } else {
    }
    %c0 = arith.constant 0 : index
    %c0_1 = arith.constant 0 : index
    %3 = vector.load %arg1[%c0, %c0_1] : memref<8x32xbf16, #tpu.memory_space<vmem>>, vector<8x32xbf16>
    %c0_2 = arith.constant 0 : index
    %c0_3 = arith.constant 0 : index
    %4 = vector.load %arg2[%c0_2, %c0_3] : memref<32x2048xbf16, #tpu.memory_space<vmem>>, vector<32x2048xbf16>
    %cst = arith.constant dense<0.000000e+00> : vector<8x2048xf32>
    %5 = tpu.matmul %3, %4, %cst {dimension_numbers = #tpu.dot_dimension_numbers<[1], [0], [0], [1], [0, 0, 1, 1], [], []>} : vector<8x32xbf16>, vector<32x2048xbf16>, vector<8x2048xf32> -> vector<8x2048xf32>
    %c0_4 = arith.constant 0 : index
    %c0_5 = arith.constant 0 : index
    %6 = vector.load %arg3[%c0_4, %c0_5] : memref<1x2048xf32, #tpu.memory_space<vmem>>, vector<1x2048xf32>
    %cst_6 = arith.constant dense<0.000000e+00> : vector<2048xf32>
    %7 = vector.multi_reduction <add>, %5, %cst_6 [0] : vector<8x2048xf32> to vector<2048xf32>
    %8 = vector.shape_cast %7 : vector<2048xf32> to vector<1x2048xf32>
    %9 = arith.addf %6, %8 : vector<1x2048xf32>
    %c0_7 = arith.constant 0 : index
    %c0_8 = arith.constant 0 : index
    %10 = vector.load %arg3[%c0_7, %c0_8] : memref<1x2048xf32, #tpu.memory_space<vmem>>, vector<1x2048xf32>
    tpu.vector_store %arg3[%c0_7, %c0_8], %9 {strides = array<i32>} : memref<1x2048xf32, #tpu.memory_space<vmem>>, vector<1x2048xf32>,
    %c0_9 = arith.constant 0 : index
    %c0_10 = arith.constant 0 : index
    %11 = vector.load %arg4[%c0_9, %c0_10] : memref<1x2048xf32, #tpu.memory_space<vmem>>, vector<1x2048xf32>
    %12 = arith.mulf %5, %5 : vector<8x2048xf32>
    %cst_11 = arith.constant dense<0.000000e+00> : vector<2048xf32>
    %13 = vector.multi_reduction <add>, %12, %cst_11 [0] : vector<8x2048xf32> to vector<2048xf32>
    %14 = vector.shape_cast %13 : vector<2048xf32> to vector<1x2048xf32>
    %15 = arith.addf %11, %14 : vector<1x2048xf32>
    %c0_12 = arith.constant 0 : index
    %c0_13 = arith.constant 0 : index
    %16 = vector.load %arg4[%c0_12, %c0_13] : memref<1x2048xf32, #tpu.memory_space<vmem>>, vector<1x2048xf32>
    tpu.vector_store %arg4[%c0_12, %c0_13], %15 {strides = array<i32>} : memref<1x2048xf32, #tpu.memory_space<vmem>>, vector<1x2048xf32>,
    return
  }
  func.func @transform_0(%arg0: i32) -> (i32, i32) {
    %c0_i32 = arith.constant 0 : i32
    %c0_i32_0 = arith.constant 0 : i32
    return %arg0, %c0_i32 : i32, i32
  }
  func.func @transform_1(%arg0: i32) -> (i32, i32) {
    %c0_i32 = arith.constant 0 : i32
    %c0_i32_0 = arith.constant 0 : i32
    %c0_i32_1 = arith.constant 0 : i32
    return %c0_i32, %c0_i32_0 : i32, i32
  }
  func.func @transform_2(%arg0: i32) -> (i32, i32) {
    %c0_i32 = arith.constant 0 : i32
    %c0_i32_0 = arith.constant 0 : i32
    %c0_i32_1 = arith.constant 0 : i32
    return %c0_i32, %c0_i32_0 : i32, i32
  }
  func.func @transform_3(%arg0: i32) -> (i32, i32) {
    %c0_i32 = arith.constant 0 : i32
    %c0_i32_0 = arith.constant 0 : i32
    %c0_i32_1 = arith.constant 0 : i32
    return %c0_i32, %c0_i32_0 : i32, i32
  }
}

</mosaic_0001>

<bundles_post_ra>
// kernel: tpu_custom_call.1
= control target key start
LH: loop header
LB: loop body
LE: loop exit
PB: predicated region body
PF: predicated region fallthrough
CT: control target
= control target key end

     0   :  { %9 = vsyncpa [#allocation3], 0  ;;  %s1433_s0 = inlined_call_operand.hbm [shape: bf16[8,32], index: 0, kind: input, shape index: {}]   ;;  %s1434_s1 = inlined_call_operand.hbm [shape: bf16[32,2048], index: 1, kind: input, shape index: {}]   ;;  %s1435_s2 = inlined_call_operand.hbm [shape: f32[1,2048], index: 2, kind: output, shape index: {0}]   ;;  %s1436_s3 = inlined_call_operand.hbm [shape: f32[1,2048], index: 3, kind: output, shape index: {1}]  }
   0x1   :  { %10 = vsyncpa [#allocation6], 0 }
   0x2   :  { %11 = vsyncpa [#allocation4], 0 }
   0x3   :  { %12 = vsyncpa [#allocation9], 0  ;;  %s1202_s12 = smov [#allocation2]   ;;  %s1203_s14 = smov [#allocation5]  }
   0x4   :  { %s19_s13 = sshll.u32 %s1202_s12, 4  ;;  %s28_s15 = sshll.u32 %s1203_s14, 4  ;;  %s20_s13 = int_to_ptr.vmem [resolvable:$true] %s19_s13  ;;  %s1230_s15 = int_to_ptr.vmem [resolvable:$true] %s28_s15 }
   0x5   :  { %s1106_s18 = scalar_lea.hbm %s1433_s0, 64 }
   0x6   :  { %p1107_p0 = scmp.ne.s32.totalorder %s1433_s0, %s1106_s18  ;;  %p1110_p1 = scmp.lt.u32.totalorder %s1106_s18, %s1433_s0 }
   0x8   :  { %p1112_p2 = pnand %p1110_p1, %p1107_p0 }
   0xa   :  { %1115 = shalt.err (!%p1112_p2)
}
   0xb   :  { %s1116_s23 = scalar_lea.vmem %s20_s13, 64  ;;  %p1121_p4 = scmp.lt.s32.totalorder %s20_s13, %s20_s13 }
   0xc   :  { %p1117_p3 = scmp.ne.s32.totalorder %s20_s13, %s1116_s23  ;;  %p1122_p5 = scmp.lt.s32.totalorder %s1116_s23, %s1116_s23 }
   0xe   :  { %p1123_p6 = por %p1122_p5, %p1121_p4 }
  0x10   :  { %p1124_p7 = pnand %p1123_p6, %p1117_p3 }
  0x12   :  { %1127 = shalt.err (!%p1124_p7)
}
  0x13   :  { %22 = dma.hbm_to_vmem [thread:$0]  %s1433_s0, 64, %s20_s13, [#allocation3]  }
  0x14   :  { %s1128_s28 = scalar_lea.hbm %s1434_s1, 4096 }
  0x15   :  { %p1129_p8 = scmp.ne.s32.totalorder %s1434_s1, %s1128_s28  ;;  %p1132_p9 = scmp.lt.u32.totalorder %s1128_s28, %s1434_s1 }
  0x17   :  { %p1134_p10 = pnand %p1132_p9, %p1129_p8 }
  0x19   :  { %1137 = shalt.err (!%p1134_p10)
}
  0x1a   :  { %s1138_s6 = scalar_lea.vmem %s1230_s15, 4096  ;;  %p1143_p12 = scmp.lt.s32.totalorder %s1230_s15, %s1230_s15 }
  0x1b   :  { %p1139_p11 = scmp.ne.s32.totalorder %s1230_s15, %s1138_s6  ;;  %p1144_p13 = scmp.lt.s32.totalorder %s1138_s6, %s1138_s6 }
  0x1d   :  { %p1145_p0 = por %p1144_p13, %p1143_p12 }
  0x1f   :  { %p1146_p1 = pnand %p1145_p0, %p1139_p11 }
  0x21   :  { %1149 = shalt.err (!%p1146_p1)
}
  0x22   :  { %s1204_s0 = smov 1024   ;;  %s1205_s7 = smov 64  }
  0x23   :  { %34 = dma.hbm_to_vmem [thread:$0]  %s1434_s1, 4096, %s1230_s15, [#allocation6], %s1204_s0, %s1204_s0, %s1205_s7  }
  0x24   :  { %1194 = dma.done.wait [#allocation3], 64  }
  0x25   :  { %1195 = vsyncadd [#allocation3], 4294967232 }
  0x26   :  { %1196 = dma.done.wait [#allocation6], 4096  }
  0x27   :  { %1197 = vsyncadd [#allocation6], 4294963200  ;;  %v1206_v0 = vmov 0   ;;  %v51_v1 = vld [vmem:[#allocation5] sm:$0xff]  ;;  %v52_v3 = vld [vmem:[#allocation5 + $0x8] sm:$0xff]  ;;  %vm243_vm0 = vcmask 261120  }
  0x28   :  { %279 = vmatprep.mubr.bf16.mxu0 %v1206_v0  ;;  %320 = vmatprep.mubr.bf16.mxu1 %v1206_v0  ;;  %v59_v2 = vld [vmem:[#allocation5 + $0x40] sm:$0xff]  ;;  %v60_v5 = vld [vmem:[#allocation5 + $0x48] sm:$0xff]  ;;  %v53_v15 = vld [vmem:[#allocation5 + $0x10] sm:$0xff]  ;;  %s1208_s1 = smov [#allocation7]   ;;  %s1209_s11 = smov [#allocation8]  }
  0x29   :  { %v1058_v4 = vcombine.high %v51_v1, %v59_v2  ;;  %v1057_v6 = vcombine.low %v51_v1, %v59_v2  ;;  %v67_v7 = vld [vmem:[#allocation5 + $0x80] sm:$0xff]  ;;  %v1060_v9 = vcombine.high %v52_v3, %v60_v5  ;;  %v1059_v10 = vcombine.low %v52_v3, %v60_v5  ;;  %v68_v12 = vld [vmem:[#allocation5 + $0x88] sm:$0xff]  ;;  %v61_v16 = vld [vmem:[#allocation5 + $0x50] sm:$0xff]  ;;  %s1033_s10 = sshll.u32 %s1208_s1, 4  ;;  %s1043_s12 = sshll.u32 %s1209_s11, 4  ;;  %s1034_s10 = int_to_ptr.vmem [resolvable:$true] %s1033_s10  ;;  %s1044_s12 = int_to_ptr.vmem [resolvable:$true] %s1043_s12 }
  0x2a   :  { %v75_v8 = vld [vmem:[#allocation5 + $0xc0] sm:$0xff]  ;;  %v76_v13 = vld [vmem:[#allocation5 + $0xc8] sm:$0xff]  ;;  %v54_v17 = vld [vmem:[#allocation5 + $0x18] sm:$0xff]  ;;  %v1062_v21 = vcombine.high %v53_v15, %v61_v16  ;;  %v1061_v28 = vcombine.low %v53_v15, %v61_v16  ;;  %v1207_v3 = vmov 1966171168   ;;  %v696_v5 = vlaneseq  ;;  %s1150_s13 = scalar_lea.vmem %s1034_s10, 256  ;;  %p1155_p3 = scmp.lt.s32.totalorder %s1034_s10, %s1034_s10 }
  0x2b   :  { %v1074_v11 = vcombine.high %v67_v7, %v75_v8  ;;  %247 = vmatprep.subr.bf16.mxu0 %v1058_v4  ;;  %v1076_v14 = vcombine.high %v68_v12, %v76_v13  ;;  %288 = vmatprep.subr.bf16.mxu1 %v1060_v9  ;;  %v1073_v18 = vcombine.low %v67_v7, %v75_v8  ;;  %v62_v19 = vld [vmem:[#allocation5 + $0x58] sm:$0xff]  ;;  %v69_v23 = vld [vmem:[#allocation5 + $0x90] sm:$0xff]  ;;  %v55_v32 = vld [vmem:[#allocation5 + $0x20] sm:$0xff]  ;;  %v694_v4 = vunpack.c.l.s4 %v1207_v3  ;;  %p1151_p2 = scmp.ne.s32.totalorder %s1034_s10, %s1150_s13  ;;  %p1156_p4 = scmp.lt.s32.totalorder %s1150_s13, %s1150_s13 }
  0x2c   :  { %248 = vmatpush1.bf16.msra.mxu0 %v1057_v6  ;;  %289 = vmatpush1.bf16.msra.mxu1 %v1059_v10  ;;  %v1075_v20 = vcombine.low %v68_v12, %v76_v13  ;;  %v1064_v22 = vcombine.high %v54_v17, %v62_v19  ;;  %v77_v24 = vld [vmem:[#allocation5 + $0xd0] sm:$0xff]  ;;  %v70_v25 = vld [vmem:[#allocation5 + $0x98] sm:$0xff]  ;;  %v1063_v29 = vcombine.low %v54_v17, %v62_v19  ;;  %v63_v33 = vld [vmem:[#allocation5 + $0x60] sm:$0xff]  ;;  %v697_v7 = vshrl.u32 %v696_v5, 7 }
  0x2d   :  { %249 = vmatprep.subr.bf16.mxu0 %v1074_v11  ;;  %290 = vmatprep.subr.bf16.mxu1 %v1076_v14  ;;  %v78_v26 = vld [vmem:[#allocation5 + $0xd8] sm:$0xff]  ;;  %v1078_v30 = vcombine.high %v69_v23, %v77_v24  ;;  %v56_v34 = vld [vmem:[#allocation5 + $0x28] sm:$0xff]  ;;  %v1077_v36 = vcombine.low %v69_v23, %v77_v24  ;;  %v1066_v38 = vcombine.high %v55_v32, %v63_v33  ;;  %v71_v40 = vld [vmem:[#allocation5 + $0xa0] sm:$0xff]  ;;  %v695_v6 = vunpack.c.0.s8 %v694_v4  ;;  %p1157_p5 = por %p1156_p4, %p1155_p3 }
  0x2e   :  { %v1263_v27 = vld [vmem:[#allocation2] sm:$0xf]  ;;  %v1080_v31 = vcombine.high %v70_v25, %v78_v26  ;;  %v64_v35 = vld [vmem:[#allocation5 + $0x68] sm:$0xff]  ;;  %v1079_v37 = vcombine.low %v70_v25, %v78_v26  ;;  %v79_v41 = vld [vmem:[#allocation5 + $0xe0] sm:$0xff]  ;;  %v1065_v44 = vcombine.low %v55_v32, %v63_v33 }
  0x2f   :  { %v1068_v39 = vcombine.high %v56_v34, %v64_v35  ;;  %v72_v42 = vld [vmem:[#allocation5 + $0xa8] sm:$0xff]  ;;  %v1067_v45 = vcombine.low %v56_v34, %v64_v35  ;;  %v1082_v46 = vcombine.high %v71_v40, %v79_v41  ;;  %v57_v48 = vld [vmem:[#allocation5 + $0x30] sm:$0xff]  ;;  %v58_v50 = vld [vmem:[#allocation5 + $0x38] sm:$0xff]  ;;  %v1081_v52 = vcombine.low %v71_v40, %v79_v41  ;;  %p1158_p6 = pnand %p1157_p5, %p1151_p2 }
  0x30   :  { %250 = vmatpush1.bf16.msra.mxu0 %v1073_v18  ;;  %291 = vmatpush1.bf16.msra.mxu1 %v1075_v20  ;;  %v80_v43 = vld [vmem:[#allocation5 + $0xe8] sm:$0xff]  ;;  %v65_v49 = vld [vmem:[#allocation5 + $0x70] sm:$0xff]  ;;  %v66_v51 = vld [vmem:[#allocation5 + $0x78] sm:$0xff]  ;;  %v1287_v13 = vsub.s32 %v695_v6, %v697_v7 }
  0x31   :  { %329 = vmatprep.subr.bf16.mxu0 %v1062_v21  ;;  %370 = vmatprep.subr.bf16.mxu1 %v1064_v22  ;;  %v1084_v47 = vcombine.high %v72_v42, %v80_v43  ;;  %v1083_v53 = vcombine.low %v72_v42, %v80_v43  ;;  %v1070_v54 = vcombine.high %v57_v48, %v65_v49  ;;  %v73_v56 = vld [vmem:[#allocation5 + $0xb0] sm:$0xff]  ;;  %v74_v58 = vld [vmem:[#allocation5 + $0xb8] sm:$0xff] }
  0x32   :  { %v1072_v55 = vcombine.high %v58_v50, %v66_v51  ;;  %v81_v57 = vld [vmem:[#allocation5 + $0xf0] sm:$0xff]  ;;  %v82_v59 = vld [vmem:[#allocation5 + $0xf8] sm:$0xff]  ;;  %v1069_v60 = vcombine.low %v57_v48, %v65_v49  ;;  %v1071_v61 = vcombine.low %v58_v50, %v66_v51 }
  0x33   :  { %1089 = vmatmul.mubr.msk.bf16.vlgmr.msra.gmra.mrb[0].mxu0 %vm243_vm0, %v1263_v27  ;;  %1090 = vmatmul.mubr.msk.bf16.vlgmr.msra.gmra.mrb[0].mxu1 %vm243_vm0, %v1263_v27  ;;  %v1086_v62 = vcombine.high %v73_v56, %v81_v57  ;;  %v1088_v63 = vcombine.high %v74_v58, %v82_v59  ;;  %v1085_v1 = vcombine.low %v73_v56, %v81_v57 }
  0x34   :  { %330 = vmatpush1.bf16.msra.mxu0 %v1061_v28  ;;  %371 = vmatpush1.bf16.msra.mxu1 %v1063_v29  ;;  %v1087_v2 = vcombine.low %v74_v58, %v82_v59 }
  0x35   :  { %331 = vmatprep.subr.bf16.mxu0 %v1078_v30  ;;  %372 = vmatprep.subr.bf16.mxu1 %v1080_v31 }
  0x36   :  { %361 = vmatprep.mubr.bf16.mxu0 %v1206_v0  ;;  %402 = vmatprep.mubr.bf16.mxu1 %v1206_v0 }
  0x38   :  { %332 = vmatpush1.bf16.msra.mxu0 %v1077_v36  ;;  %373 = vmatpush1.bf16.msra.mxu1 %v1079_v37 }
  0x39   :  { %411 = vmatprep.subr.bf16.mxu0 %v1066_v38  ;;  %452 = vmatprep.subr.bf16.mxu1 %v1068_v39 }
  0x3b   :  { %1091 = vmatmul.mubr.msk.bf16.vlgmr.msra.gmra.mrb[4].mxu0 %vm243_vm0, %v1263_v27  ;;  %1092 = vmatmul.mubr.msk.bf16.vlgmr.msra.gmra.mrb[4].mxu1 %vm243_vm0, %v1263_v27 }
  0x3c   :  { %412 = vmatpush1.bf16.msra.mxu0 %v1065_v44  ;;  %453 = vmatpush1.bf16.msra.mxu1 %v1067_v45 }
  0x3d   :  { %413 = vmatprep.subr.bf16.mxu0 %v1082_v46  ;;  %454 = vmatprep.subr.bf16.mxu1 %v1084_v47 }
  0x3e   :  { %443 = vmatprep.mubr.bf16.mxu0 %v1206_v0  ;;  %484 = vmatprep.mubr.bf16.mxu1 %v1206_v0 }
  0x40   :  { %414 = vmatpush1.bf16.msra.mxu0 %v1081_v52  ;;  %455 = vmatpush1.bf16.msra.mxu1 %v1083_v53 }
  0x41   :  { %493 = vmatprep.subr.bf16.mxu0 %v1070_v54  ;;  %534 = vmatprep.subr.bf16.mxu1 %v1072_v55 }
  0x43   :  { %1093 = vmatmul.mubr.msk.bf16.vlgmr.msra.gmra.mrb[8].mxu0 %vm243_vm0, %v1263_v27  ;;  %1094 = vmatmul.mubr.msk.bf16.vlgmr.msra.gmra.mrb[8].mxu1 %vm243_vm0, %v1263_v27 }
  0x44   :  { %494 = vmatpush1.bf16.msra.mxu0 %v1069_v60  ;;  %535 = vmatpush1.bf16.msra.mxu1 %v1071_v61 }
  0x45   :  { %495 = vmatprep.subr.bf16.mxu0 %v1086_v62  ;;  %536 = vmatprep.subr.bf16.mxu1 %v1088_v63 }
  0x46   :  { %525 = vmatprep.mubr.bf16.mxu0 %v1206_v0  ;;  %566 = vmatprep.mubr.bf16.mxu1 %v1206_v0 }
  0x48   :  { %496 = vmatpush1.bf16.msra.mxu0 %v1085_v1  ;;  %537 = vmatpush1.bf16.msra.mxu1 %v1087_v2 }
  0x4b   :  { %1095 = vmatmul.mubr.msk.bf16.vlgmr.msra.gmra.mrb[12].mxu0 %vm243_vm0, %v1263_v27  ;;  %1096 = vmatmul.mubr.msk.bf16.vlgmr.msra.gmra.mrb[12].mxu1 %vm243_vm0, %v1263_v27 }
 0x106   :  { %v281_v8 = vpop.f32.mrb[0].mxu0  ;;  %v322_v11 = vpop.f32.mrb[0].mxu1 }
 0x107   :  { %v577_v9 = vrot.slane %v281_v8, 4  ;;  %v795_v10 = vmul.f32 %v281_v8, %v281_v8  ;;  %v283_v12 = vpop.f32.mrb[1].mxu0  ;;  %v589_v0 = vrot.slane %v322_v11, 4  ;;  %v797_v14 = vmul.f32 %v322_v11, %v322_v11  ;;  %v324_v17 = vpop.f32.mrb[1].mxu1 }
 0x108   :  { %v583_v15 = vrot.slane %v283_v12, 4  ;;  %v796_v16 = vmul.f32 %v283_v12, %v283_v12  ;;  %v285_v18 = vpop.f32.mrb[2].mxu0  ;;  %v595_v21 = vrot.slane %v324_v17, 4  ;;  %v798_v22 = vmul.f32 %v324_v17, %v324_v17  ;;  %v326_v23 = vpop.f32.mrb[2].mxu1 }
 0x109   :  { %v578_v19 = vadd.f32 %v577_v9, %v281_v8  ;;  %v811_v20 = vrot.slane %v795_v10, 4  ;;  %v286_v24 = vpop.f32.mrb[3].mxu0  ;;  %v590_v25 = vadd.f32 %v589_v0, %v322_v11  ;;  %v823_v26 = vrot.slane %v797_v14, 4  ;;  %v327_v29 = vpop.f32.mrb[3].mxu1 }
 0x10a   :  { %v584_v27 = vadd.f32 %v583_v15, %v283_v12  ;;  %v817_v28 = vrot.slane %v796_v16, 4  ;;  %v596_v32 = vadd.f32 %v595_v21, %v324_v17  ;;  %v829_v33 = vrot.slane %v798_v22, 4 }
 0x10b   :  { %v579_v30 = vrot.slane %v578_v19, 2  ;;  %v812_v31 = vadd.f32 %v811_v20, %v795_v10  ;;  %v591_v34 = vrot.slane %v590_v25, 2  ;;  %v824_v35 = vadd.f32 %v823_v26, %v797_v14 }
 0x10c   :  { %v585_v36 = vrot.slane %v584_v27, 2  ;;  %v818_v37 = vadd.f32 %v817_v28, %v796_v16  ;;  %v597_v40 = vrot.slane %v596_v32, 2  ;;  %v830_v41 = vadd.f32 %v829_v33, %v798_v22 }
 0x10d   :  { %v580_v38 = vadd.f32 %v579_v30, %v578_v19  ;;  %v813_v39 = vrot.slane %v812_v31, 2  ;;  %v592_v42 = vadd.f32 %v591_v34, %v590_v25  ;;  %v825_v43 = vrot.slane %v824_v35, 2 }
 0x10e   :  { %v586_v44 = vadd.f32 %v585_v36, %v584_v27  ;;  %v819_v45 = vrot.slane %v818_v37, 2  ;;  %v363_v46 = vpop.f32.mrb[4].mxu0  ;;  %v598_v49 = vadd.f32 %v597_v40, %v596_v32  ;;  %v831_v50 = vrot.slane %v830_v41, 2  ;;  %v404_v51 = vpop.f32.mrb[4].mxu1 }
 0x10f   :  { %v581_v47 = vrot.slane %v580_v38, 1  ;;  %v814_v48 = vadd.f32 %v813_v39, %v812_v31  ;;  %v365_v52 = vpop.f32.mrb[5].mxu0  ;;  %v593_v53 = vrot.slane %v592_v42, 1  ;;  %v826_v54 = vadd.f32 %v825_v43, %v824_v35  ;;  %v406_v57 = vpop.f32.mrb[5].mxu1 }
 0x110   :  { %v587_v55 = vrot.slane %v586_v44, 1  ;;  %v820_v56 = vadd.f32 %v819_v45, %v818_v37  ;;  %v367_v58 = vpop.f32.mrb[6].mxu0  ;;  %v599_v61 = vrot.slane %v598_v49, 1  ;;  %v832_v62 = vadd.f32 %v831_v50, %v830_v41  ;;  %v408_v63 = vpop.f32.mrb[6].mxu1 }
 0x111   :  { %v582_v59 = vadd.f32 %v581_v47, %v580_v38  ;;  %v815_v60 = vrot.slane %v814_v48, 1  ;;  %v368_v1 = vpop.f32.mrb[7].mxu0  ;;  %v594_v2 = vadd.f32 %v593_v53, %v592_v42  ;;  %v827_v3 = vrot.slane %v826_v54, 1  ;;  %v409_v6 = vpop.f32.mrb[7].mxu1 }
 0x112   :  { %v588_v4 = vadd.f32 %v587_v55, %v586_v44  ;;  %v821_v5 = vrot.slane %v820_v56, 1  ;;  %v600_v8 = vadd.f32 %v599_v61, %v598_v49  ;;  %v833_v9 = vrot.slane %v832_v62, 1 }
 0x113   :  { %v1289_v7 = vadd.f32 %v815_v60, %v814_v48  ;;  %v601_v10 = vrot.slane %v363_v46, 4  ;;  %v1291_v11 = vadd.f32 %v827_v3, %v826_v54  ;;  %v799_v14 = vmul.f32 %v363_v46, %v363_v46 }
 0x114   :  { %v689_v12 = vcombine.low %v582_v59, %v588_v4  ;;  %v1293_v0 = vadd.f32 %v821_v5, %v820_v56  ;;  %v690_v15 = vcombine.low %v594_v2, %v600_v8  ;;  %v1295_v16 = vadd.f32 %v833_v9, %v832_v62 }
 0x115   :  { %v602_v17 = vadd.f32 %v601_v10, %v363_v46  ;;  %v613_v18 = vrot.slane %v404_v51, 4  ;;  %v835_v21 = vrot.slane %v799_v14, 4  ;;  %v801_v22 = vmul.f32 %v404_v51, %v404_v51 }
 0x116   :  { %v1298_v19 = vrot.slane %v689_v12, %v1287_v13  ;;  %v923_v20 = vcombine.low %v1289_v7, %v1293_v0  ;;  %v445_v23 = vpop.f32.mrb[8].mxu0  ;;  %v1303_v24 = vrot.slane %v690_v15, %v1287_v13  ;;  %v924_v25 = vcombine.low %v1291_v11, %v1295_v16  ;;  %v1307_v28 = vpop.f32.mrb[8].mxu1 }
 0x117   :  { %v603_v26 = vrot.slane %v602_v17, 2  ;;  %v614_v27 = vadd.f32 %v613_v18, %v404_v51  ;;  %v1309_v29 = vpop.f32.mrb[9].mxu0  ;;  %v836_v30 = vadd.f32 %v835_v21, %v799_v14  ;;  %v847_v31 = vrot.slane %v801_v22, 4  ;;  %v1311_v33 = vpop.f32.mrb[9].mxu1 }
 0x118   :  { %v607_v32 = vrot.slane %v365_v52, 4  ;;  %v449_v34 = vpop.f32.mrb[10].mxu0  ;;  %v721_v35 = vcombine.low %v1298_v19, %v1303_v24  ;;  %v490_v38 = vpop.f32.mrb[10].mxu1  ;;  %v800_v43 = vmul.f32 %v365_v52, %v365_v52  ;;  %v619_v47 = vrot.slane %v406_v57, 4 }
 0x119   :  { %v604_v36 = vadd.f32 %v603_v26, %v602_v17  ;;  %v615_v37 = vrot.slane %v614_v27, 2  ;;  %v450_v39 = vpop.f32.mrb[11].mxu0  ;;  %v837_v40 = vrot.slane %v836_v30, 2  ;;  %v848_v41 = vadd.f32 %v847_v31, %v801_v22  ;;  %v491_v44 = vpop.f32.mrb[11].mxu1 }
 0x11a   :  { %v608_v42 = vadd.f32 %v607_v32, %v365_v52  ;;  %v802_v48 = vmul.f32 %v406_v57, %v406_v57  ;;  %v841_v53 = vrot.slane %v800_v43, 4  ;;  %v620_v56 = vadd.f32 %v619_v47, %v406_v57 }
 0x11b   :  { %v605_v45 = vrot.slane %v604_v36, 1  ;;  %v616_v46 = vadd.f32 %v615_v37, %v614_v27  ;;  %v838_v49 = vadd.f32 %v837_v40, %v836_v30  ;;  %v849_v50 = vrot.slane %v848_v41, 2 }
 0x11c   :  { %v609_v51 = vrot.slane %v608_v42, 2  ;;  %v853_v58 = vrot.slane %v802_v48, 4  ;;  %v842_v62 = vadd.f32 %v841_v53, %v800_v43  ;;  %v621_v1 = vrot.slane %v620_v56, 2 }
 0x11d   :  { %v606_v54 = vadd.f32 %v605_v45, %v604_v36  ;;  %v617_v55 = vrot.slane %v616_v46, 1  ;;  %v839_v59 = vrot.slane %v838_v49, 1  ;;  %v850_v60 = vadd.f32 %v849_v50, %v848_v41 }
 0x11e   :  { %v610_v61 = vadd.f32 %v609_v51, %v608_v42  ;;  %v1315_v63 = vpop.f32.mrb[12].mxu0  ;;  %v854_v2 = vadd.f32 %v853_v58, %v802_v48  ;;  %v625_v3 = vrot.slane %v445_v23, 4  ;;  %v1317_v4 = vpop.f32.mrb[12].mxu1  ;;  %v843_v57 = vrot.slane %v842_v62, 2 }
 0x11f   :  { %v618_v52 = vadd.f32 %v617_v55, %v616_v46  ;;  %v1319_v5 = vpop.f32.mrb[13].mxu0  ;;  %v1321_v6 = vadd.f32 %v839_v59, %v838_v49  ;;  %v851_v8 = vrot.slane %v850_v60, 1  ;;  %v1323_v10 = vpop.f32.mrb[13].mxu1  ;;  %v622_v14 = vadd.f32 %v621_v1, %v620_v56 }
 0x120   :  { %v611_v9 = vrot.slane %v610_v61, 1  ;;  %v531_v12 = vpop.f32.mrb[14].mxu0  ;;  %v855_v15 = vrot.slane %v854_v2, 2  ;;  %v626_v17 = vadd.f32 %v625_v3, %v445_v23  ;;  %v803_v18 = vmul.f32 %v445_v23, %v445_v23  ;;  %v572_v21 = vpop.f32.mrb[14].mxu1 }
 0x121   :  { %v532_v22 = vpop.f32.mrb[15].mxu0  ;;  %v1325_v26 = vadd.f32 %v851_v8, %v850_v60  ;;  %v844_v30 = vadd.f32 %v843_v57, %v842_v62  ;;  %v637_v31 = vrot.slane %v1307_v28, 4  ;;  %v573_v32 = vpop.f32.mrb[15].mxu1  ;;  %v623_v34 = vrot.slane %v622_v14, 1 }
 0x122   :  { %v612_v27 = vadd.f32 %v611_v9, %v610_v61  ;;  %v856_v36 = vadd.f32 %v855_v15, %v854_v2  ;;  %v627_v37 = vrot.slane %v626_v17, 2  ;;  %v859_v38 = vrot.slane %v803_v18, 4 }
 0x123   :  { %v845_v40 = vrot.slane %v844_v30, 1  ;;  %v638_v41 = vadd.f32 %v637_v31, %v1307_v28  ;;  %v805_v23 = vmul.f32 %v1307_v28, %v1307_v28  ;;  %v624_v42 = vadd.f32 %v623_v34, %v622_v14 }
 0x124   :  { %v691_v39 = vcombine.low %v606_v54, %v612_v27  ;;  %v857_v43 = vrot.slane %v856_v36, 1  ;;  %v628_v44 = vadd.f32 %v627_v37, %v626_v17  ;;  %v860_v45 = vadd.f32 %v859_v38, %v803_v18 }
 0x125   :  { %v846_v47 = vadd.f32 %v845_v40, %v844_v30  ;;  %v639_v48 = vrot.slane %v638_v41, 2  ;;  %v871_v49 = vrot.slane %v805_v23, 4  ;;  %v692_v50 = vcombine.low %v618_v52, %v624_v42 }
 0x126   :  { %v1332_v46 = vrot.slane %v691_v39, %v1287_v13  ;;  %v1334_v51 = vadd.f32 %v857_v43, %v856_v36  ;;  %v629_v53 = vrot.slane %v628_v44, 1  ;;  %v861_v54 = vrot.slane %v860_v45, 2 }
 0x127   :  { %v925_v55 = vcombine.low %v1321_v6, %v846_v47  ;;  %v640_v56 = vadd.f32 %v639_v48, %v638_v41  ;;  %v872_v58 = vadd.f32 %v871_v49, %v805_v23  ;;  %v631_v28 = vrot.slane %v1309_v29, 4 }
 0x128   :  { %v1339_v59 = vrot.slane %v692_v50, %v1287_v13  ;;  %v926_v60 = vcombine.low %v1325_v26, %v1334_v51  ;;  %v862_v61 = vadd.f32 %v861_v54, %v860_v45  ;;  %v1348_v2 = vrot.slane %v923_v20, %v1287_v13 }
 0x129   :  { %v641_v62 = vrot.slane %v640_v56, 1  ;;  %v873_v1 = vrot.slane %v872_v58, 2  ;;  %v632_v52 = vadd.f32 %v631_v28, %v1309_v29  ;;  %v1354_v3 = vrot.slane %v924_v25, %v1287_v13 }
 0x12a   :  { %v722_v6 = vcombine.low %v1332_v46, %v1339_v59  ;;  %v804_v8 = vmul.f32 %v1309_v29, %v1309_v29  ;;  %v630_v9 = vadd.f32 %v629_v53, %v628_v44  ;;  %v643_v14 = vrot.slane %v1311_v33, 4 }
 0x12b   :  { %v874_v57 = vadd.f32 %v873_v1, %v872_v58  ;;  %v633_v12 = vrot.slane %v632_v52, 2  ;;  %v863_v7 = vrot.slane %v862_v61, 1  ;;  %v806_v20 = vmul.f32 %v1311_v33, %v1311_v33 }
 0x12c   :  { %v865_v0 = vrot.slane %v804_v8, 4  ;;  %v649_v11 = vrot.slane %v1315_v63, 4  ;;  %v642_v16 = vadd.f32 %v641_v62, %v640_v56  ;;  %v644_v15 = vadd.f32 %v643_v14, %v1311_v33 }
 0x12d   :  { %v634_v25 = vadd.f32 %v633_v12, %v632_v52  ;;  %v807_v17 = vmul.f32 %v1315_v63, %v1315_v63  ;;  %v877_v18 = vrot.slane %v806_v20, 4  ;;  %v661_v22 = vrot.slane %v1317_v4, 4 }
 0x12e   :  { %v866_v29 = vadd.f32 %v865_v0, %v804_v8  ;;  %v650_v21 = vadd.f32 %v649_v11, %v1315_v63  ;;  %v875_v26 = vrot.slane %v874_v57, 1  ;;  %v645_v30 = vrot.slane %v644_v15, 2 }
 0x12f   :  { %v635_v27 = vrot.slane %v634_v25, 1  ;;  %v883_v31 = vrot.slane %v807_v17, 4  ;;  %v878_v34 = vadd.f32 %v877_v18, %v806_v20  ;;  %v662_v37 = vadd.f32 %v661_v22, %v1317_v4 }
 0x130   :  { %v867_v32 = vrot.slane %v866_v29, 2  ;;  %v651_v36 = vrot.slane %v650_v21, 2  ;;  %v646_v33 = vadd.f32 %v645_v30, %v644_v15  ;;  %v809_v40 = vmul.f32 %v1317_v4, %v1317_v4 }
 0x131   :  { %v636_v38 = vadd.f32 %v635_v27, %v634_v25  ;;  %v884_v39 = vadd.f32 %v883_v31, %v807_v17  ;;  %v879_v23 = vrot.slane %v878_v34, 2  ;;  %v663_v42 = vrot.slane %v662_v37, 2 }
 0x132   :  { %v868_v41 = vadd.f32 %v867_v32, %v866_v29  ;;  %v652_v63 = vadd.f32 %v651_v36, %v650_v21  ;;  %v647_v44 = vrot.slane %v646_v33, 1  ;;  %v895_v47 = vrot.slane %v809_v40, 4 }
 0x133   :  { %v738_v43 = vcombine.low %v630_v9, %v636_v38  ;;  %v885_v45 = vrot.slane %v884_v39, 2  ;;  %v947_v48 = vrot.slane %v925_v55, %v1287_v13  ;;  %v864_v49 = vadd.f32 %v863_v7, %v862_v61 }
 0x134   :  { %v869_v50 = vrot.slane %v868_v41, 1  ;;  %v880_v51 = vadd.f32 %v879_v23, %v878_v34  ;;  %v648_v53 = vadd.f32 %v647_v44, %v646_v33  ;;  %v653_v54 = vrot.slane %v652_v63, 1 }
 0x135   :  { %v664_v56 = vadd.f32 %v663_v42, %v662_v37  ;;  %v896_v58 = vadd.f32 %v895_v47, %v809_v40  ;;  %v876_v28 = vadd.f32 %v875_v26, %v874_v57  ;;  %v1374_v4 = vrot.slane %v738_v43, %v1287_v13 }
 0x136   :  { %v870_v62 = vadd.f32 %v869_v50, %v868_v41  ;;  %v881_v1 = vrot.slane %v880_v51, 1  ;;  %v739_v52 = vcombine.low %v642_v16, %v648_v53  ;;  %v886_v8 = vadd.f32 %v885_v45, %v884_v39 }
 0x137   :  { %v897_v9 = vrot.slane %v896_v58, 2  ;;  %v655_v12 = vrot.slane %v1319_v5, 4  ;;  %v954_v55 = vrot.slane %v926_v60, %v1287_v13  ;;  %v808_v7 = vmul.f32 %v1319_v5, %v1319_v5 }
 0x138   :  { %v972_v61 = vcombine.low %v864_v49, %v870_v62  ;;  %v882_v14 = vadd.f32 %v881_v1, %v880_v51  ;;  %v755_v0 = vrot.slane %v739_v52, %v1287_v13  ;;  %v654_v57 = vadd.f32 %v653_v54, %v652_v63 }
 0x139   :  { %v665_v20 = vrot.slane %v664_v56, 1  ;;  %v656_v11 = vadd.f32 %v655_v12, %v1319_v5  ;;  %v898_v15 = vadd.f32 %v897_v9, %v896_v58  ;;  %v889_v16 = vrot.slane %v808_v7, 4 }
 0x13a   :  { %v973_v25 = vcombine.low %v876_v28, %v882_v14  ;;  %v667_v17 = vrot.slane %v1323_v10, 4  ;;  %v770_v29 = vcombine.low %v1374_v4, %v755_v0  ;;  %v887_v18 = vrot.slane %v886_v8, 1 }
 0x13b   :  { %v657_v60 = vrot.slane %v656_v11, 2  ;;  %v810_v21 = vmul.f32 %v1323_v10, %v1323_v10  ;;  %v982_v22 = vrot.slane %v972_v61, %v1287_v13  ;;  %v890_v27 = vadd.f32 %v889_v16, %v808_v7 }
 0x13c   :  { %v989_v26 = vrot.slane %v973_v25, %v1287_v13  ;;  %v668_v30 = vadd.f32 %v667_v17, %v1323_v10  ;;  %v729_v32 = vrot.slane %v721_v35, %v1287_v13  ;;  %v736_v34 = vrot.slane %v722_v6, %v1287_v13 }
 0x13d   :  { %v658_v5 = vadd.f32 %v657_v60, %v656_v11  ;;  %v901_v31 = vrot.slane %v810_v21, 4  ;;  %v899_v36 = vrot.slane %v898_v15, 1  ;;  %v891_v37 = vrot.slane %v890_v27, 2 }
 0x13e   :  { %v669_v38 = vrot.slane %v668_v30, 2  ;;  %v955_v33 = vcombine.low %v1348_v2, %v1354_v3  ;;  %v737_v40 = vcombine.low %v729_v32, %v736_v34  ;;  %v956_v41 = vcombine.low %v947_v48, %v954_v55 }
 0x13f   :  { %v659_v39 = vrot.slane %v658_v5, 1  ;;  %v902_v10 = vadd.f32 %v901_v31, %v810_v21  ;;  %v892_v23 = vadd.f32 %v891_v37, %v890_v27  ;;  %v1004_v24 = vcombine.low %v982_v22, %v989_v26 }
 0x140   :  { %v670_v63 = vadd.f32 %v669_v38, %v668_v30  ;;  %v963_v19 = vrot.slane %v955_v33, %v1287_v13  ;;  %v970_v46 = vrot.slane %v956_v41, %v1287_v13  ;;  %v888_v59 = vadd.f32 %v887_v18, %v886_v8  ;;  %791 = vst [vmem:[#allocation7] sm:$0xff] %v737_v40 }
 0x141   :  { %v660_v35 = vadd.f32 %v659_v39, %v658_v5  ;;  %v903_v42 = vrot.slane %v902_v10, 2  ;;  %v666_v6 = vadd.f32 %v665_v20, %v664_v56  ;;  %v893_v43 = vrot.slane %v892_v23, 1 }
 0x142   :  { %v671_v44 = vrot.slane %v670_v63, 1  ;;  %v971_v2 = vcombine.low %v963_v19, %v970_v46  ;;  %v900_v48 = vadd.f32 %v899_v36, %v898_v15  ;;  %v778_v52 = vrot.slane %v770_v29, %v1287_v13 }
 0x143   :  { %v740_v45 = vcombine.low %v654_v57, %v660_v35  ;;  %v904_v47 = vadd.f32 %v903_v42, %v902_v10  ;;  %v894_v3 = vadd.f32 %v893_v43, %v892_v23  ;;  %v1012_v55 = vrot.slane %v1004_v24, %v1287_v13 }
 0x144   :  { %v672_v49 = vadd.f32 %v671_v44, %v670_v63  ;;  %1025 = vst [vmem:[#allocation8] sm:$0xff] %v971_v2 }
 0x145   :  { %v905_v50 = vrot.slane %v904_v47, 1  ;;  %v762_v51 = vrot.slane %v740_v45, %v1287_v13  ;;  %v974_v53 = vcombine.low %v888_v59, %v894_v3 }
 0x146   :  { %v741_v54 = vcombine.low %v666_v6, %v672_v49 }
 0x147   :  { %v906_v58 = vadd.f32 %v905_v50, %v904_v47  ;;  %v996_v56 = vrot.slane %v974_v53, %v1287_v13 }
 0x148   :  { %v769_v28 = vrot.slane %v741_v54, %v1287_v13 }
 0x149   :  { %v975_v4 = vcombine.low %v900_v48, %v906_v58 }
 0x14a   :  { %v771_v62 = vcombine.low %v762_v51, %v769_v28 }
 0x14b   :  { %v1003_v1 = vrot.slane %v975_v4, %v1287_v13 }
 0x14c   :  { %v785_v8 = vrot.slane %v771_v62, %v1287_v13 }
 0x14d   :  { %v1005_v9 = vcombine.low %v996_v56, %v1003_v1 }
 0x14e   :  { %v786_v12 = vcombine.low %v778_v52, %v785_v8 }
 0x14f   :  { %v1019_v61 = vrot.slane %v1005_v9, %v1287_v13 }
 0x150   :  { %792 = vst [vmem:[#allocation7 + $0x8] sm:$0xff] %v786_v12 }
 0x151   :  { %v1020_v14 = vcombine.low %v1012_v55, %v1019_v61 }
 0x152   :  { %1161 = shalt.err (!%p1158_p6)
}
 0x153   :  { %s1162_s16 = scalar_lea.hbm %s1435_s2, 256 }
 0x154   :  { %p1163_p7 = scmp.ne.s32.totalorder %s1435_s2, %s1162_s16  ;;  %p1166_p8 = scmp.lt.u32.totalorder %s1162_s16, %s1435_s2 }
 0x156   :  { %p1168_p9 = pnand %p1166_p8, %p1163_p7 }
 0x158   :  { %1171 = shalt.err (!%p1168_p9)
}
 0x159   :  { %1036 = dma.vmem_to_hbm [thread:$0]  %s1034_s10, 256, %s1435_s2, [#allocation4]   ;;  %1026 = vst [vmem:[#allocation8 + $0x8] sm:$0xff] %v1020_v14 }
 0x15a   :  { %s1172_s23 = scalar_lea.vmem %s1044_s12, 256  ;;  %p1177_p11 = scmp.lt.s32.totalorder %s1044_s12, %s1044_s12 }
 0x15b   :  { %p1173_p10 = scmp.ne.s32.totalorder %s1044_s12, %s1172_s23  ;;  %p1178_p12 = scmp.lt.s32.totalorder %s1172_s23, %s1172_s23 }
 0x15d   :  { %p1179_p13 = por %p1178_p12, %p1177_p11 }
 0x15f   :  { %p1180_p0 = pnand %p1179_p13, %p1173_p10 }
 0x161   :  { %1183 = shalt.err (!%p1180_p0)
}
 0x162   :  { %s1184_s26 = scalar_lea.hbm %s1436_s3, 256 }
 0x163   :  { %p1185_p1 = scmp.ne.s32.totalorder %s1436_s3, %s1184_s26  ;;  %p1188_p2 = scmp.lt.u32.totalorder %s1184_s26, %s1436_s3 }
 0x165   :  { %p1190_p3 = pnand %p1188_p2, %p1185_p1 }
 0x167   :  { %1193 = shalt.err (!%p1190_p3)
}
 0x168   :  { %1046 = dma.vmem_to_hbm [thread:$0]  %s1044_s12, 256, %s1436_s3, [#allocation9]  }
 0x169   :  { %1198 = dma.done.wait [#allocation4], 256  }
 0x16a   :  { %1199 = vsyncadd [#allocation4], 4294967040 }
 0x16b   :  { %1200 = dma.done.wait [#allocation9], 256  }
 0x16c   :  { %1201 = vsyncadd [#allocation9], 4294967040 }
 0x16d   :  { %1053 = vsyncpa [#allocation3], 1 }
 0x16e   :  { %1054 = vsyncpa [#allocation6], 1 }
 0x16f   :  { %1055 = vsyncpa [#allocation4], 1 }
 0x170   :  { %1056 = vsyncpa [#allocation9], 1 }

</bundles_post_ra>
